<compile_context>
chip_gen: v5e
topology: v5e:2x2
jax: 0.10.0
libtpu: 0.0.40
codegen_flags: <defaults>
</compile_context>

<pallas_src>
import functools
import math

import jax
import jax.numpy as jnp
from jax.experimental import pallas as pl
from jax.experimental.pallas import tpu as pltpu


def _round_up(n: int, m: int) -> int:
    return ((n + m - 1) // m) * m


def _tpu_budgets():
    """Per-generation VMEM budgets (limit, kernel-1 tile bytes, contrast chunk)."""
    vmem_cap = None
    try:
        info = pltpu.get_tpu_info()
        vmem_cap = getattr(info, "vmem_capacity_bytes", None)
    except Exception:
        vmem_cap = None
    if vmem_cap is None:
        vmem_cap = 64 * 1024 * 1024                    # conservative: v7x / TC
    if vmem_cap >= 100 * 1024 * 1024:                  # v5e / v6e (128 MiB)
        return {"vmem_limit": 96 * 1024 * 1024,
                "k1_buf": 20 * 1024 * 1024,
                "tb_max": 2048}
    return {"vmem_limit": 44 * 1024 * 1024,            # v7x (64 MiB per TC)
            "k1_buf": 8 * 1024 * 1024,
            "tb_max": 2048}


# --------------------------------------------------------------------------- #
# Kernel 1: features = mean(x, axis=-1) on flattened (B*V, D) rows.
#   Input tile stays in its native dtype (bf16/f32/...); accumulate in f32.
# --------------------------------------------------------------------------- #
def _feature_mean_kernel(x_ref, f_ref):
    # x_ref: (TR, D) native-dtype tile, f_ref: (TR, 1) f32
    x = x_ref[...].astype(jnp.float32)
    f_ref[...] = jnp.mean(x, axis=1, keepdims=True)


# --------------------------------------------------------------------------- #
# Kernel 2: per-anchor SupCon loss, streaming LSE over contrast chunks.
#   grid = (anchor tiles ["parallel"], contrast chunks ["arbitrary", last]).
# --------------------------------------------------------------------------- #
def _supcon_loss_kernel(fa_ref, labc_ref, fc_ref, labr_ref, loss_ref,
                        m_sc, d_sc, ps_sc, cnt_sc,
                        *, inv_temp: float, neg_scale: float, batch: int):
    # fa_ref  : (TM, V)  f32   anchor feature tile
    # labc_ref: (TM, 1)  int32 anchor labels
    # fc_ref  : (TB, V)  f32   contrast feature chunk (untransposed)
    # labr_ref: (1,  TB) int32 contrast labels chunk
    # loss_ref: (TM, 1)  f32   per-anchor loss (written on last contrast step)
    # m/d/ps/cnt_sc: (TM, 1) f32 streaming-LSE state
    i = pl.program_id(0)
    kb = pl.program_id(1)
    n_kb = pl.num_programs(1)
    tm = fa_ref.shape[0]
    tb = fc_ref.shape[0]

    @pl.when(kb == 0)
    def _():
        m_sc[...] = jnp.full(m_sc.shape, -jnp.inf, m_sc.dtype)
        d_sc[...] = jnp.zeros(d_sc.shape, d_sc.dtype)
        ps_sc[...] = jnp.zeros(ps_sc.shape, ps_sc.dtype)
        cnt_sc[...] = jnp.zeros(cnt_sc.shape, cnt_sc.dtype)

    # 1/temperature folded into the small (TM, V) operand, not the (TM, TB) slab.
    fa = fa_ref[...] * inv_temp
    s = jax.lax.dot_general(fa, fc_ref[...],
                            (((1,), (1,)), ((), ())),
                            preferred_element_type=jnp.float32)      # (TM, TB)

    # Exclusion mask (self-contrast diagonal + padded contrast columns) from
    # 1-D broadcast iotas; no materialized (TM, TB) iota slabs.
    row_g = jax.lax.broadcasted_iota(jnp.int32, (tm, 1), 0) + i * tm   # (TM,1)
    col_g = jax.lax.broadcasted_iota(jnp.int32, (1, tb), 1) + kb * tb  # (1,TB)
    excl = jnp.logical_or(row_g == col_g, col_g >= batch)              # (TM,TB)

    same = labc_ref[...] == labr_ref[...]                              # (TM,TB)
    pos = jnp.where(excl, 0.0, same.astype(jnp.float32))

    # Online log-sum-exp over the contrast axis (raw logits tracked for the
    # positive sum; max-shift only affects the denominator -> exact vs torch).
    m_old = m_sc[...]
    m_new = jnp.maximum(m_old, jnp.max(s, axis=1, keepdims=True))
    alpha = jnp.exp(m_old - m_new)                                     # (TM,1)
    contrib = jnp.sum(jnp.where(excl, 0.0, jnp.exp(s - m_new)),
                      axis=1, keepdims=True)
    m_sc[...] = m_new
    d_sc[...] = d_sc[...] * alpha + contrib
    ps_sc[...] = ps_sc[...] + jnp.sum(pos * s, axis=1, keepdims=True)
    cnt_sc[...] = cnt_sc[...] + jnp.sum(pos, axis=1, keepdims=True)

    @pl.when(kb == n_kb - 1)
    def _():
        log_denom = m_sc[...] + jnp.log(d_sc[...])
        # NOTE: anchors whose class appears only once give 0/0 -> NaN, exactly
        # like the PyTorch module (documented precondition, no silent guard).
        mean_log_prob_pos = ps_sc[...] / cnt_sc[...] - log_denom
        loss_ref[...] = neg_scale * mean_log_prob_pos


# --------------------------------------------------------------------------- #
# Wrapper
# --------------------------------------------------------------------------- #
def supcon_loss(x, labels, *, temperature: float = 1.0,
                base_temperature: float = 1.0, tm: int | None = None,
                tr: int | None = None, tb: int | None = None):
    """Pallas implementation of SupConLoss.forward (contrast_count = 1 path)."""
    B = x.shape[0]
    D = x.shape[-1]
    V = 1
    for d in x.shape[1:-1]:
        V *= d
    V = max(V, 1)
    R = B * V
    # Native dtype all the way into kernel 1 (no wrapper f32 cast / HBM copy).
    x2d = x.reshape(R, D)
    itemsize = jnp.dtype(x.dtype).itemsize

    bud = _tpu_budgets()

    # ---- Kernel 2 tiling (decides how many padded feature rows we need) ---- #
    if tm is None:
        tm = min(128, _round_up(B, 8))
    assert tm % 8 == 0 and tm >= 8
    if tb is None:
        single = _round_up(B, tm)
        tb = single if single <= bud["tb_max"] else bud["tb_max"]
    B_pad = _round_up(B, math.lcm(tm, tb))
    # (1, tb) label block: last dim must be a multiple of 128 or the full dim.
    assert tb % 128 == 0 or tb == B_pad, "tb must be a multiple of 128 or full"
    assert B_pad % tm == 0 and B_pad % tb == 0

    # ---- Kernel 1: row mean over D ----------------------------------------- #
    # Sublane alignment follows dtype packing: f32 -> 8, bf16 -> 16, int8 -> 32.
    align = 8 * max(1, 4 // itemsize)
    R_need = B_pad * V                       # features must cover padded batch
    if tr is None:
        tr = (bud["k1_buf"] // max(1, D * itemsize)) // align * align
        tr = max(align, min(tr, _round_up(R_need, align)))
    assert tr % align == 0 and tr >= align
    R_pad = _round_up(R_need, tr)
    if R_pad != R:
        x2d = jnp.pad(x2d, ((0, R_pad - R), (0, 0)))   # pad rows -> feature 0

    feat_col = pl.pallas_call(
        _feature_mean_kernel,
        out_shape=jax.ShapeDtypeStruct((R_pad, 1), jnp.float32),
        grid=(R_pad // tr,),
        in_specs=[pl.BlockSpec((tr, D), lambda i: (i, 0))],
        out_specs=pl.BlockSpec((tr, 1), lambda i: (i, 0)),
        compiler_params=pltpu.CompilerParams(
            dimension_semantics=("parallel",),
            vmem_limit_bytes=bud["vmem_limit"]),
        cost_estimate=pl.CostEstimate(
            flops=R_pad * D,
            transcendentals=0,
            bytes_accessed=R_pad * D * itemsize + R_pad * 4),
    )(x2d)

    # Only glue left between the kernels: one tiny (KB-scale) reshape; the
    # transpose is gone (kernel 2 contracts the untransposed features).
    features = feat_col[: B_pad * V].reshape(B_pad, V)            # (B_pad, V)

    lab = labels.reshape(-1).astype(jnp.int32)
    lab_col = lab.reshape(B, 1)
    lab_row = lab.reshape(1, B)
    if B_pad != B:
        lab_col = jnp.pad(lab_col, ((0, B_pad - B), (0, 0)))
        lab_row = jnp.pad(lab_row, ((0, 0), (0, B_pad - B)))
        # Padded contrast columns are excluded in-kernel via col >= B; padded
        # anchor rows are sliced off before the final mean.

    kernel = functools.partial(
        _supcon_loss_kernel,
        inv_temp=1.0 / float(temperature),
        neg_scale=-(float(temperature) / float(base_temperature)),
        batch=B,
    )

    n_i = B_pad // tm
    n_kb = B_pad // tb
    per_anchor = pl.pallas_call(
        kernel,
        out_shape=jax.ShapeDtypeStruct((B_pad, 1), jnp.float32),
        grid=(n_i, n_kb),
        in_specs=[
            pl.BlockSpec((tm, V), lambda i, kb: (i, 0)),   # anchor features
            pl.BlockSpec((tm, 1), lambda i, kb: (i, 0)),   # anchor labels
            pl.BlockSpec((tb, V), lambda i, kb: (kb, 0)),  # contrast features
            pl.BlockSpec((1, tb), lambda i, kb: (0, kb)),  # contrast labels
        ],
        out_specs=pl.BlockSpec((tm, 1), lambda i, kb: (i, 0)),
        scratch_shapes=[pltpu.VMEM((tm, 1), jnp.float32)] * 4,
        compiler_params=pltpu.CompilerParams(
            dimension_semantics=("parallel", "arbitrary"),
            vmem_limit_bytes=bud["vmem_limit"]),
        cost_estimate=pl.CostEstimate(
            flops=2 * B_pad * B_pad * V + 12 * B_pad * B_pad,
            transcendentals=B_pad * B_pad,
            bytes_accessed=(B_pad * V * (n_i + 1) + B_pad * (n_i + 2)
                            + B_pad) * 4),
    )(features, lab_col, features, lab_row)

    # Final mean over the real anchors (padded rows discarded).
    return jnp.mean(per_anchor[:B, 0])


# --------------------------------------------------------------------------- #
# Pure-JAX reference mirroring the PyTorch forward (for correctness check).
# --------------------------------------------------------------------------- #
def _supcon_loss_ref(x, labels, temperature=1.0, base_temperature=1.0):
    B = x.shape[0]
    x3 = x.reshape(B, -1, x.shape[-1]).astype(jnp.float32)
    features = jnp.mean(x3, axis=-1)                            # (B, V)
    mask = (labels[:, None] == labels[None, :]).astype(jnp.float32)
    logits = (features @ features.T) / temperature
    logits_mask = 1.0 - jnp.eye(B, dtype=jnp.float32)
    mask = mask * logits_mask
    exp_logits = jnp.exp(logits) * logits_mask
    log_prob = logits - jnp.log(jnp.sum(exp_logits, axis=1, keepdims=True))
    mean_log_prob_pos = jnp.sum(mask * log_prob, axis=1) / jnp.sum(mask, axis=1)
    loss = -(temperature / base_temperature) * mean_log_prob_pos
    return jnp.mean(loss)


if __name__ == "__main__":
    key = jax.random.PRNGKey(0)

    # --- Test 1: small batch, f32, default tiles (single contrast chunk). --- #
    B, D = 24, 32
    x = jax.random.normal(key, (B, 2, 2, D), dtype=jnp.float32)
    labels = (jnp.arange(B, dtype=jnp.int32) % 6)   # every class appears 4x
    ref = _supcon_loss_ref(x, labels, temperature=0.5, base_temperature=1.0)
    loss = jax.block_until_ready(
        supcon_loss(x, labels, temperature=0.5, base_temperature=1.0))
    assert jnp.allclose(loss, ref, atol=1e-4, rtol=1e-4), (loss, ref)

    # --- Test 2: force small tiles (multi-step anchor & kernel-1 grids). ---- #
    loss_tiled = jax.block_until_ready(
        supcon_loss(x, labels, temperature=0.5, base_temperature=1.0,
                    tm=8, tr=16))
    assert jnp.allclose(loss_tiled, ref, atol=1e-4, rtol=1e-4), (loss_tiled, ref)

    # --- Test 3: bf16 input path (native dtype into kernel 1, f32 accum). --- #
    x_bf = x.astype(jnp.bfloat16)
    ref_bf = _supcon_loss_ref(x_bf, labels, temperature=0.5, base_temperature=1.0)
    loss_bf = jax.block_until_ready(
        supcon_loss(x_bf, labels, temperature=0.5, base_temperature=1.0))
    assert jnp.allclose(loss_bf, ref_bf, atol=2e-3, rtol=2e-3), (loss_bf, ref_bf)

    # --- Test 4: streaming contrast chunks + padded/invalid column masking. - #
    key2 = jax.random.PRNGKey(0)
    B2, D2 = 160, 32
    x2 = jax.random.normal(key2, (B2, 2, D2), dtype=jnp.float32)
    labels2 = (jnp.arange(B2, dtype=jnp.int32) % 10)
    ref2 = _supcon_loss_ref(x2, labels2, temperature=0.7, base_temperature=1.0)
    loss2 = jax.block_until_ready(
        supcon_loss(x2, labels2, temperature=0.7, base_temperature=1.0,
                    tb=128))   # 2 contrast chunks, B_pad=256 > B=160
    assert jnp.allclose(loss2, ref2, atol=1e-4, rtol=1e-4), (loss2, ref2)

    print("KERNEL_OK")
</pallas_src>

<mosaic_0001>
module attributes {stable_mosaic.version = 11 : i64} {
  func.func @_feature_mean_kernel(%arg0: i32, %arg1: memref<96x32xf32, #tpu.memory_space<vmem>>, %arg2: memref<96x1xf32, #tpu.memory_space<vmem>>) attributes {dimension_semantics = [#tpu.dimension_semantics<parallel>], iteration_bounds = array<i64: 1>, scalar_prefetch = 0 : i64, scratch_operands = 0 : i64, tpu.core_type = #tpu.core_type<tc>, window_params = [{transform_indices = @transform_0, window_bounds = array<i64: 96, 32>}, {transform_indices = @transform_1, window_bounds = array<i64: 96, 1>}]} {
    %c0 = arith.constant 0 : index
    %c0_0 = arith.constant 0 : index
    %0 = vector.load %arg1[%c0, %c0_0] : memref<96x32xf32, #tpu.memory_space<vmem>>, vector<96x32xf32>
    %cst = arith.constant dense<0.000000e+00> : vector<96xf32>
    %1 = vector.multi_reduction <add>, %0, %cst [1] : vector<96x32xf32> to vector<96xf32>
    %2 = vector.shape_cast %1 : vector<96xf32> to vector<96x1xf32>
    %cst_1 = arith.constant 3.200000e+01 : f32
    %3 = vector.broadcast %cst_1 : f32 to vector<96x1xf32>
    %4 = arith.divf %2, %3 : vector<96x1xf32>
    %c0_2 = arith.constant 0 : index
    %c0_3 = arith.constant 0 : index
    %5 = vector.load %arg2[%c0_2, %c0_3] : memref<96x1xf32, #tpu.memory_space<vmem>>, vector<96x1xf32>
    tpu.vector_store %arg2[%c0_2, %c0_3], %4 {strides = array<i32>} : memref<96x1xf32, #tpu.memory_space<vmem>>, vector<96x1xf32>,
    return
  }
  func.func @transform_0(%arg0: i32) -> (i32, i32) {
    %c0_i32 = arith.constant 0 : i32
    %c0_i32_0 = arith.constant 0 : i32
    return %arg0, %c0_i32 : i32, i32
  }
  func.func @transform_1(%arg0: i32) -> (i32, i32) {
    %c0_i32 = arith.constant 0 : i32
    %c0_i32_0 = arith.constant 0 : i32
    return %arg0, %c0_i32 : i32, i32
  }
}

</mosaic_0001>

<bundles_post_ra>
// kernel: tpu_custom_call.1
= control target key start
LH: loop header
LB: loop body
LE: loop exit
PB: predicated region body
PF: predicated region fallthrough
CT: control target
= control target key end

     0   :  { %vm20_vm0 = vcmask 261120   ;;  %v96_v24 = vmov 32.0   ;;  %vm76_vm2 = vcmask 7168   ;;  %s203_s0 = inlined_call_operand.vmem [shape: f32[96,32], index: 0, kind: input, shape index: {}]   ;;  %s204_s1 = inlined_call_operand.vmem [shape: f32[96,1], index: 1, kind: output, shape index: {}]  }
   0x1   :  { %v12_v0 = vld [vmem:[%s203_s0 + $0x20] sm:$0xff]  ;;  %v10_v1 = vld [vmem:[%s203_s0 + $0x10] sm:$0xff]  ;;  %v13_v6 = vld [vmem:[%s203_s0 + $0x28] sm:$0xff]  ;;  %94 = vrcp.f32 %v96_v24 }
   0x2   :  { %v8_v2 = vld [vmem:[%s203_s0] sm:$0xff]  ;;  %v33_v3 = vsel %vm20_vm0, %v12_v0, 0.0  ;;  %v27_v4 = vsel %vm20_vm0, %v10_v1, 0.0  ;;  %v11_v7 = vld [vmem:[%s203_s0 + $0x18] sm:$0xff]  ;;  %v9_v8 = vld [vmem:[%s203_s0 + $0x8] sm:$0xff]  ;;  %v36_v9 = vsel %vm20_vm0, %v13_v6, 0.0 }
   0x3   :  { %v21_v5 = vsel %vm20_vm0, %v8_v2, 0.0  ;;  %34 = vadd.xlane.f32.xlu2 %v33_v3  ;;  %28 = vadd.xlane.f32.xlu1 %v27_v4  ;;  %v30_v10 = vsel %vm20_vm0, %v11_v7, 0.0  ;;  %v24_v11 = vsel %vm20_vm0, %v9_v8, 0.0  ;;  %v16_v12 = vld [vmem:[%s203_s0 + $0x40] sm:$0xff]  ;;  %v15_v13 = vld [vmem:[%s203_s0 + $0x38] sm:$0xff]  ;;  %v14_v14 = vld [vmem:[%s203_s0 + $0x30] sm:$0xff] }
   0x4   :  { %22 = vadd.xlane.f32.xlu0 %v21_v5  ;;  %v45_v15 = vsel %vm20_vm0, %v16_v12, 0.0  ;;  %v42_v16 = vsel %vm20_vm0, %v15_v13, 0.0  ;;  %v39_v17 = vsel %vm20_vm0, %v14_v14, 0.0  ;;  %v19_v18 = vld [vmem:[%s203_s0 + $0x58] sm:$0xff]  ;;  %v18_v19 = vld [vmem:[%s203_s0 + $0x50] sm:$0xff]  ;;  %v17_v20 = vld [vmem:[%s203_s0 + $0x48] sm:$0xff] }
   0x5   :  { %v54_v21 = vsel %vm20_vm0, %v19_v18, 0.0  ;;  %v51_v22 = vsel %vm20_vm0, %v18_v19, 0.0  ;;  %v48_v23 = vsel %vm20_vm0, %v17_v20, 0.0 }
   0x7   :  { %v95_v25 = vpop.eup %94 }
   0x8   :  { %v58_v26 = vmul.f32 32.0, %v95_v25  ;;  %vm62_vm1 = vweird.f32 %v95_v25 }
   0xa   :  { %v59_v27 = vsub.f32 1.0, %v58_v26 }
   0xb   :  { %37 = vadd.xlane.f32.xlu2 %v36_v9  ;;  %31 = vadd.xlane.f32.xlu1 %v30_v10 }
   0xc   :  { %25 = vadd.xlane.f32.xlu0 %v24_v11  ;;  %v60_v28 = vmul.f32 %v95_v25, %v59_v27 }
   0xe   :  { %v61_v29 = vadd.f32 %v95_v25, %v60_v28 }
  0x10   :  { %v63_v30 = vsel %vm62_vm1, %v95_v25, %v61_v29 }
  0x13   :  { %46 = vadd.xlane.f32.xlu2 %v45_v15  ;;  %43 = vadd.xlane.f32.xlu1 %v42_v16 }
  0x14   :  { %40 = vadd.xlane.f32.xlu0 %v39_v17 }
  0x1b   :  { %55 = vadd.xlane.f32.xlu2 %v54_v21  ;;  %52 = vadd.xlane.f32.xlu1 %v51_v22 }
  0x1c   :  { %49 = vadd.xlane.f32.xlu0 %v48_v23 }
  0x76   :  { %v35_v31 = vpop.xlane.xlu2 %34  ;;  %v29_v32 = vpop.xlane.xlu1 %28 }
  0x77   :  { %v68_v33 = vmul.f32 %v63_v30, %v35_v31  ;;  %v66_v34 = vmul.f32 %v63_v30, %v29_v32  ;;  %v23_v35 = vpop.xlane.xlu0 %22 }
  0x78   :  { %v64_v36 = vmul.f32 %v63_v30, %v23_v35 }
  0x79   :  { %81 = vst.msk [vmem:[%s204_s1 + $0x20] sm:$0xff] %vm76_vm2, %v68_v33 }
  0x7a   :  { %79 = vst.msk [vmem:[%s204_s1 + $0x10] sm:$0xff] %vm76_vm2, %v66_v34 }
  0x7b   :  { %77 = vst.msk [vmem:[%s204_s1] sm:$0xff] %vm76_vm2, %v64_v36 }
  0x7e   :  { %v38_v37 = vpop.xlane.xlu2 %37  ;;  %v32_v38 = vpop.xlane.xlu1 %31 }
  0x7f   :  { %v69_v39 = vmul.f32 %v63_v30, %v38_v37  ;;  %v67_v40 = vmul.f32 %v63_v30, %v32_v38  ;;  %v26_v41 = vpop.xlane.xlu0 %25 }
  0x80   :  { %v65_v42 = vmul.f32 %v63_v30, %v26_v41 }
  0x81   :  { %82 = vst.msk [vmem:[%s204_s1 + $0x28] sm:$0xff] %vm76_vm2, %v69_v39 }
  0x82   :  { %80 = vst.msk [vmem:[%s204_s1 + $0x18] sm:$0xff] %vm76_vm2, %v67_v40 }
  0x83   :  { %78 = vst.msk [vmem:[%s204_s1 + $0x8] sm:$0xff] %vm76_vm2, %v65_v42 }
  0x86   :  { %v47_v43 = vpop.xlane.xlu2 %46  ;;  %v44_v44 = vpop.xlane.xlu1 %43 }
  0x87   :  { %v72_v45 = vmul.f32 %v63_v30, %v47_v43  ;;  %v71_v46 = vmul.f32 %v63_v30, %v44_v44  ;;  %v41_v47 = vpop.xlane.xlu0 %40 }
  0x88   :  { %v70_v48 = vmul.f32 %v63_v30, %v41_v47 }
  0x89   :  { %85 = vst.msk [vmem:[%s204_s1 + $0x40] sm:$0xff] %vm76_vm2, %v72_v45 }
  0x8a   :  { %84 = vst.msk [vmem:[%s204_s1 + $0x38] sm:$0xff] %vm76_vm2, %v71_v46 }
  0x8b   :  { %83 = vst.msk [vmem:[%s204_s1 + $0x30] sm:$0xff] %vm76_vm2, %v70_v48 }
  0x8e   :  { %v56_v49 = vpop.xlane.xlu2 %55  ;;  %v53_v50 = vpop.xlane.xlu1 %52 }
  0x8f   :  { %v75_v51 = vmul.f32 %v63_v30, %v56_v49  ;;  %v74_v52 = vmul.f32 %v63_v30, %v53_v50  ;;  %v50_v53 = vpop.xlane.xlu0 %49 }
  0x90   :  { %v73_v54 = vmul.f32 %v63_v30, %v50_v53 }
  0x91   :  { %88 = vst.msk [vmem:[%s204_s1 + $0x58] sm:$0xff] %vm76_vm2, %v75_v51 }
  0x92   :  { %87 = vst.msk [vmem:[%s204_s1 + $0x50] sm:$0xff] %vm76_vm2, %v74_v52 }
  0x93   :  { %86 = vst.msk [vmem:[%s204_s1 + $0x48] sm:$0xff] %vm76_vm2, %v73_v54 }

</bundles_post_ra>
